<compile_context>
chip_gen: v7x
topology: tpu7x:2x2x1
jax: 0.10.0
libtpu: 0.0.40
codegen_flags: <defaults>
</compile_context>

<pallas_src>
import functools

import jax
import jax.numpy as jnp
import numpy as np
from jax.experimental import pallas as pl
from jax.experimental.pallas import tpu as pltpu

_VMEM_LIMIT_BYTES = 48 * 1024 * 1024  # explicit scoped-VMEM budget, headroom under v7x's 64 MiB


def _layer_norm(h, g, b, eps=1e-5):
    mu = jnp.mean(h, axis=-1, keepdims=True)
    var = jnp.mean((h - mu) ** 2, axis=-1, keepdims=True)
    return (h - mu) * jax.lax.rsqrt(var + eps) * g + b


# ---------------------------------------------------------------------------
# Pass 1: LayerNorm1 + fused Q/K/V projections.
# Wq / bq already carry the head_dim**-0.5 scaling (folded in by prepare_params).
# ---------------------------------------------------------------------------
def _ln_qkv_kernel(x_ref, ln_g_ref, ln_b_ref,
                   wq_ref, bq_ref, wk_ref, bk_ref, wv_ref, bv_ref,
                   q_ref, k_ref, v_ref):
    x = x_ref[0]                                              # (TQ, D) f32
    h = _layer_norm(x, ln_g_ref[...], ln_b_ref[...])          # f32
    hb = h.astype(jnp.bfloat16)                               # bf16 operands for the MXU
    q = jnp.dot(hb, wq_ref[...], preferred_element_type=jnp.float32) + bq_ref[...]
    k = jnp.dot(hb, wk_ref[...], preferred_element_type=jnp.float32) + bk_ref[...]
    v = jnp.dot(hb, wv_ref[...], preferred_element_type=jnp.float32) + bv_ref[...]
    q_ref[0] = q.astype(q_ref.dtype)
    k_ref[0] = k.astype(k_ref.dtype)
    v_ref[0] = v.astype(v_ref.dtype)


# ---------------------------------------------------------------------------
# Pass 2: attention for one query tile against the full-sequence K/V, then
# residual add, LayerNorm2 and the FFN, all on the (TQ, D) tile.
# ---------------------------------------------------------------------------
def _attn_ffn_kernel(x_ref, q_ref, k_ref, v_ref, mask_ref,
                     wo_ref, bo_ref, ln2_g_ref, ln2_b_ref,
                     w1_ref, b1_ref, w2_ref, b2_ref,
                     out_ref, *, n_head, head_dim):
    x = x_ref[0]          # (TQ, D) f32  (residual input)
    q = q_ref[0]          # (TQ, D) bf16 (already scaled by head_dim**-0.5)
    k = k_ref[0]          # (S,  D) bf16
    v = v_ref[0]          # (S,  D) bf16
    mask = mask_ref[0]    # (1,  S) f32, 0.0 marks padding keys

    tq = x.shape[0]
    s = k.shape[0]

    # Additive key-padding bias, computed and broadcast once (hoisted out of the head loop).
    # NOTE: a query row whose keys are ALL padded gets a uniform attention distribution here,
    # whereas the PyTorch reference would produce NaN (softmax over all -inf).
    mask_bias = jnp.broadcast_to(
        jnp.where(mask == 0.0, jnp.float32(-1e30), jnp.float32(0.0)), (tq, s))

    # residual + output-projection bias; per-head contributions accumulate below.
    acc = x + bo_ref[...]
    for hh in range(n_head):
        lo = hh * head_dim
        qh = q[:, lo:lo + head_dim]                           # (TQ, hd) bf16
        kh = k[:, lo:lo + head_dim]                           # (S,  hd) bf16
        vh = v[:, lo:lo + head_dim]                           # (S,  hd) bf16
        # Contract the last dims of both operands -> no materialized K transpose.
        scores = jax.lax.dot_general(
            qh, kh, dimension_numbers=(((1,), (1,)), ((), ())),
            preferred_element_type=jnp.float32)               # (TQ, S) f32
        scores = scores + mask_bias
        m = jnp.max(scores, axis=-1, keepdims=True)
        e = jnp.exp(scores - m)
        denom = jnp.sum(e, axis=-1, keepdims=True)
        p = (e * pl.reciprocal(denom, approx=True)).astype(jnp.bfloat16)
        head_out = jnp.dot(p, vh, preferred_element_type=jnp.float32)       # (TQ, hd)
        # Fold the head concat into the output projection: rows [lo, lo+hd) of Wo.
        acc = acc + jnp.dot(head_out.astype(jnp.bfloat16),
                            wo_ref[lo:lo + head_dim, :],
                            preferred_element_type=jnp.float32)
    x1 = acc  # residual + attention output
    # TODO(synk): dropout is identity in eval mode; training-mode dropout not implemented.

    # ---- feed-forward sub-block (pre-LN) ----
    h2 = _layer_norm(x1, ln2_g_ref[...], ln2_b_ref[...]).astype(jnp.bfloat16)
    f = jnp.dot(h2, w1_ref[...], preferred_element_type=jnp.float32) + b1_ref[...]
    f = jnp.maximum(f, 0.0).astype(jnp.bfloat16)
    # NOTE: for very large dim_ff on v7x (64 MiB VMEM), tile dim_ff here with an accumulator.
    f = jnp.dot(f, w2_ref[...], preferred_element_type=jnp.float32) + b2_ref[...]
    out_ref[0] = x1 + f


def prepare_params(params, n_head):
    """One-time parameter preparation: fold head_dim**-0.5 into Wq/bq and cast the matmul
    weights to bf16 (LayerNorm params and biases stay f32)."""
    d_model = params["wq"].shape[0]
    head_dim = d_model // n_head
    scaling = head_dim ** -0.5
    p = dict(params)
    p["wq"] = p["wq"] * jnp.float32(scaling)
    p["bq"] = p["bq"] * jnp.float32(scaling)
    for name in ("wq", "wk", "wv", "wo", "w1", "w2"):
        p[name] = p[name].astype(jnp.bfloat16)
    return p


def transformer_encoder_layer(x, mask, params, n_head, *, tq=None):
    """x: (B, S, D) f32; mask: (B, S), 0 = padding. params from prepare_params().
    Returns (B, S, D) f32."""
    B, S, D = x.shape
    dim_ff = params["w1"].shape[1]
    assert D % n_head == 0
    head_dim = D // n_head

    if tq is None:
        tq = S if S <= 256 else 256       # query tile (sublane-aligned when S > 8)
    assert S % tq == 0
    n_qt = S // tq

    mask3 = mask.reshape(B, 1, S).astype(jnp.float32)

    def fixed(shape):                     # weight block, constant across the grid
        zeros = (0,) * len(shape)
        return pl.BlockSpec(shape, lambda b, s, _z=zeros: _z)

    compiler_params = pltpu.CompilerParams(
        dimension_semantics=("parallel", "parallel"),
        vmem_limit_bytes=_VMEM_LIMIT_BYTES)

    # ---- pass 1: LN1 + Q/K/V projections ----
    q, k, v = pl.pallas_call(
        _ln_qkv_kernel,
        out_shape=[jax.ShapeDtypeStruct((B, S, D), jnp.bfloat16)] * 3,
        grid=(B, n_qt),
        in_specs=[
            pl.BlockSpec((1, tq, D), lambda b, s: (b, s, 0)),   # x tile
            fixed((1, D)), fixed((1, D)),                       # ln1 gamma/beta
            fixed((D, D)), fixed((1, D)),                       # Wq (pre-scaled), bq
            fixed((D, D)), fixed((1, D)),                       # Wk, bk
            fixed((D, D)), fixed((1, D)),                       # Wv, bv
        ],
        out_specs=[pl.BlockSpec((1, tq, D), lambda b, s: (b, s, 0))] * 3,
        compiler_params=compiler_params,
    )(x, params["ln1_g"], params["ln1_b"],
      params["wq"], params["bq"], params["wk"], params["bk"],
      params["wv"], params["bv"])

    # ---- pass 2: attention (q tile vs full-seq K/V) + residual + LN2 + FFN ----
    kernel2 = functools.partial(_attn_ffn_kernel, n_head=n_head, head_dim=head_dim)
    out = pl.pallas_call(
        kernel2,
        out_shape=jax.ShapeDtypeStruct((B, S, D), jnp.float32),
        grid=(B, n_qt),
        in_specs=[
            pl.BlockSpec((1, tq, D), lambda b, s: (b, s, 0)),   # x (residual) tile
            pl.BlockSpec((1, tq, D), lambda b, s: (b, s, 0)),   # q tile
            pl.BlockSpec((1, S, D), lambda b, s: (b, 0, 0)),    # K, full sequence
            pl.BlockSpec((1, S, D), lambda b, s: (b, 0, 0)),    # V, full sequence
            pl.BlockSpec((1, 1, S), lambda b, s: (b, 0, 0)),    # key mask
            fixed((D, D)), fixed((1, D)),                       # Wo, bo
            fixed((1, D)), fixed((1, D)),                       # ln2 gamma/beta
            fixed((D, dim_ff)), fixed((1, dim_ff)),             # W1, b1
            fixed((dim_ff, D)), fixed((1, D)),                  # W2, b2
        ],
        out_specs=pl.BlockSpec((1, tq, D), lambda b, s: (b, s, 0)),
        compiler_params=compiler_params,
    )(x, q, k, v, mask3,
      params["wo"], params["bo"], params["ln2_g"], params["ln2_b"],
      params["w1"], params["b1"], params["w2"], params["b2"])
    return out


def _reference(x, mask, params, n_head):
    """Pure-JAX f32 reference mirroring the PyTorch forward (eval mode)."""
    B, S, D = x.shape
    hd = D // n_head
    scaling = hd ** -0.5

    def ln(h, g, b):
        mu = jnp.mean(h, axis=-1, keepdims=True)
        var = jnp.mean((h - mu) ** 2, axis=-1, keepdims=True)
        return (h - mu) / jnp.sqrt(var + 1e-5) * g + b

    residual = x
    h = ln(x, params["ln1_g"], params["ln1_b"])
    q = (h @ params["wq"] + params["bq"]) * scaling
    k = h @ params["wk"] + params["bk"]
    v = h @ params["wv"] + params["bv"]
    q = q.reshape(B, S, n_head, hd)
    k = k.reshape(B, S, n_head, hd)
    v = v.reshape(B, S, n_head, hd)
    scores = jnp.einsum("bqnh,bknh->bqkn", q, k)
    key_mask = (mask == 0)[:, None, :, None]
    scores = jnp.where(key_mask, -jnp.inf, scores)
    attn = jax.nn.softmax(scores, axis=2)
    out = jnp.einsum("bqkn,bknh->bqnh", attn, v).reshape(B, S, D)
    out = out @ params["wo"] + params["bo"]
    x1 = residual + out

    residual2 = x1
    h2 = ln(x1, params["ln2_g"], params["ln2_b"])
    f = jnp.maximum(h2 @ params["w1"] + params["b1"], 0.0)
    f = f @ params["w2"] + params["b2"]
    return residual2 + f


if __name__ == "__main__":
    B, S, D, N_HEAD, DIM_FF = 2, 8, 32, 4, 64

    key = jax.random.PRNGKey(0)
    keys = jax.random.split(key, 14)

    def w(k, shape, scale=0.05):
        return jax.random.normal(k, shape, dtype=jnp.float32) * scale

    # nn.Linear weights are (out, in); stored transposed as (in, out) so kernels compute
    # x @ W + b.
    params_f32 = {
        "ln1_g": jnp.ones((1, D), jnp.float32),
        "ln1_b": jnp.zeros((1, D), jnp.float32),
        "wq": w(keys[0], (D, D)), "bq": w(keys[1], (1, D)),
        "wk": w(keys[2], (D, D)), "bk": w(keys[3], (1, D)),
        "wv": w(keys[4], (D, D)), "bv": w(keys[5], (1, D)),
        "wo": w(keys[6], (D, D)), "bo": w(keys[7], (1, D)),
        "ln2_g": jnp.ones((1, D), jnp.float32),
        "ln2_b": jnp.zeros((1, D), jnp.float32),
        "w1": w(keys[8], (D, DIM_FF)), "b1": w(keys[9], (1, DIM_FF)),
        "w2": w(keys[10], (DIM_FF, D)), "b2": w(keys[11], (1, D)),
    }

    x = jax.random.normal(keys[12], (B, S, D), dtype=jnp.float32)
    # mask: 1 = real token, 0 = padding (last two positions of batch 1 padded)
    mask = jnp.ones((B, S), jnp.float32).at[1, S - 2:].set(0.0)

    prepped = prepare_params(params_f32, N_HEAD)
    out = transformer_encoder_layer(x, mask, prepped, N_HEAD)
    out = jax.block_until_ready(out)

    ref = _reference(x, mask, params_f32, N_HEAD)
    # bf16 matmul operands (f32 accumulation) + approx reciprocal vs pure-f32 reference.
    np.testing.assert_allclose(np.asarray(out), np.asarray(ref), atol=2e-2, rtol=2e-2)

    print("KERNEL_OK")
</pallas_src>

<mosaic_0001>
module attributes {stable_mosaic.version = 11 : i64} {
  func.func @_ln_qkv_kernel(%arg0: i32, %arg1: i32, %arg2: memref<1x8x32xf32, #tpu.memory_space<vmem>>, %arg3: memref<1x32xf32, #tpu.memory_space<vmem>>, %arg4: memref<1x32xf32, #tpu.memory_space<vmem>>, %arg5: memref<32x32xbf16, #tpu.memory_space<vmem>>, %arg6: memref<1x32xf32, #tpu.memory_space<vmem>>, %arg7: memref<32x32xbf16, #tpu.memory_space<vmem>>, %arg8: memref<1x32xf32, #tpu.memory_space<vmem>>, %arg9: memref<32x32xbf16, #tpu.memory_space<vmem>>, %arg10: memref<1x32xf32, #tpu.memory_space<vmem>>, %arg11: memref<1x8x32xbf16, #tpu.memory_space<vmem>>, %arg12: memref<1x8x32xbf16, #tpu.memory_space<vmem>>, %arg13: memref<1x8x32xbf16, #tpu.memory_space<vmem>>) attributes {dimension_semantics = [#tpu.dimension_semantics<parallel>, #tpu.dimension_semantics<parallel>], iteration_bounds = array<i64: 2, 1>, scalar_prefetch = 0 : i64, scratch_operands = 0 : i64, tpu.core_type = #tpu.core_type<tc>, window_params = [{transform_indices = @transform_0, window_bounds = array<i64: 1, 8, 32>}, {pipeline_mode = #tpu.pipeline_mode<synchronous>, transform_indices = @transform_1, window_bounds = array<i64: 1, 32>}, {pipeline_mode = #tpu.pipeline_mode<synchronous>, transform_indices = @transform_2, window_bounds = array<i64: 1, 32>}, {pipeline_mode = #tpu.pipeline_mode<synchronous>, transform_indices = @transform_3, window_bounds = array<i64: 32, 32>}, {pipeline_mode = #tpu.pipeline_mode<synchronous>, transform_indices = @transform_4, window_bounds = array<i64: 1, 32>}, {pipeline_mode = #tpu.pipeline_mode<synchronous>, transform_indices = @transform_5, window_bounds = array<i64: 32, 32>}, {pipeline_mode = #tpu.pipeline_mode<synchronous>, transform_indices = @transform_6, window_bounds = array<i64: 1, 32>}, {pipeline_mode = #tpu.pipeline_mode<synchronous>, transform_indices = @transform_7, window_bounds = array<i64: 32, 32>}, {pipeline_mode = #tpu.pipeline_mode<synchronous>, transform_indices = @transform_8, window_bounds = array<i64: 1, 32>}, {transform_indices = @transform_9, window_bounds = array<i64: 1, 8, 32>}, {transform_indices = @transform_10, window_bounds = array<i64: 1, 8, 32>}, {transform_indices = @transform_11, window_bounds = array<i64: 1, 8, 32>}]} {
    %c0 = arith.constant 0 : index
    %c0_0 = arith.constant 0 : index
    %c0_1 = arith.constant 0 : index
    %0 = vector.load %arg2[%c0, %c0_0, %c0_1] : memref<1x8x32xf32, #tpu.memory_space<vmem>>, vector<1x8x32xf32>
    %1 = vector.shape_cast %0 : vector<1x8x32xf32> to vector<8x32xf32>
    %c0_2 = arith.constant 0 : index
    %c0_3 = arith.constant 0 : index
    %2 = vector.load %arg3[%c0_2, %c0_3] : memref<1x32xf32, #tpu.memory_space<vmem>>, vector<1x32xf32>
    %c0_4 = arith.constant 0 : index
    %c0_5 = arith.constant 0 : index
    %3 = vector.load %arg4[%c0_4, %c0_5] : memref<1x32xf32, #tpu.memory_space<vmem>>, vector<1x32xf32>
    %cst = arith.constant dense<0.000000e+00> : vector<8xf32>
    %4 = vector.multi_reduction <add>, %1, %cst [1] : vector<8x32xf32> to vector<8xf32>
    %5 = vector.shape_cast %4 : vector<8xf32> to vector<8x1xf32>
    %cst_6 = arith.constant 3.200000e+01 : f32
    %6 = vector.broadcast %cst_6 : f32 to vector<8x1xf32>
    %7 = arith.divf %5, %6 : vector<8x1xf32>
    %8 = vector.broadcast %7 : vector<8x1xf32> to vector<8x32xf32>
    %9 = arith.subf %1, %8 : vector<8x32xf32>
    %10 = arith.mulf %9, %9 : vector<8x32xf32>
    %cst_7 = arith.constant dense<0.000000e+00> : vector<8xf32>
    %11 = vector.multi_reduction <add>, %10, %cst_7 [1] : vector<8x32xf32> to vector<8xf32>
    %12 = vector.shape_cast %11 : vector<8xf32> to vector<8x1xf32>
    %cst_8 = arith.constant 3.200000e+01 : f32
    %13 = vector.broadcast %cst_8 : f32 to vector<8x1xf32>
    %14 = arith.divf %12, %13 : vector<8x1xf32>
    %15 = vector.broadcast %7 : vector<8x1xf32> to vector<8x32xf32>
    %16 = arith.subf %1, %15 : vector<8x32xf32>
    %cst_9 = arith.constant 9.99999974E-6 : f32
    %17 = vector.broadcast %cst_9 : f32 to vector<8x1xf32>
    %18 = arith.addf %14, %17 : vector<8x1xf32>
    %19 = math.rsqrt %18 : vector<8x1xf32>
    %20 = vector.broadcast %19 : vector<8x1xf32> to vector<8x32xf32>
    %21 = arith.mulf %16, %20 : vector<8x32xf32>
    %22 = vector.broadcast %2 : vector<1x32xf32> to vector<8x32xf32>
    %23 = arith.mulf %21, %22 : vector<8x32xf32>
    %24 = vector.broadcast %3 : vector<1x32xf32> to vector<8x32xf32>
    %25 = arith.addf %23, %24 : vector<8x32xf32>
    %26 = arith.truncf %25 : vector<8x32xf32> to vector<8x32xbf16>
    %c0_10 = arith.constant 0 : index
    %c0_11 = arith.constant 0 : index
    %27 = vector.load %arg5[%c0_10, %c0_11] : memref<32x32xbf16, #tpu.memory_space<vmem>>, vector<32x32xbf16>
    %cst_12 = arith.constant dense<0.000000e+00> : vector<8x32xf32>
    %28 = tpu.matmul %26, %27, %cst_12 {dimension_numbers = #tpu.dot_dimension_numbers<[1], [0], [0], [1], [0, 0, 1, 1], [], []>} : vector<8x32xbf16>, vector<32x32xbf16>, vector<8x32xf32> -> vector<8x32xf32>
    %c0_13 = arith.constant 0 : index
    %c0_14 = arith.constant 0 : index
    %29 = vector.load %arg6[%c0_13, %c0_14] : memref<1x32xf32, #tpu.memory_space<vmem>>, vector<1x32xf32>
    %30 = vector.broadcast %29 : vector<1x32xf32> to vector<8x32xf32>
    %31 = arith.addf %28, %30 : vector<8x32xf32>
    %c0_15 = arith.constant 0 : index
    %c0_16 = arith.constant 0 : index
    %32 = vector.load %arg7[%c0_15, %c0_16] : memref<32x32xbf16, #tpu.memory_space<vmem>>, vector<32x32xbf16>
    %cst_17 = arith.constant dense<0.000000e+00> : vector<8x32xf32>
    %33 = tpu.matmul %26, %32, %cst_17 {dimension_numbers = #tpu.dot_dimension_numbers<[1], [0], [0], [1], [0, 0, 1, 1], [], []>} : vector<8x32xbf16>, vector<32x32xbf16>, vector<8x32xf32> -> vector<8x32xf32>
    %c0_18 = arith.constant 0 : index
    %c0_19 = arith.constant 0 : index
    %34 = vector.load %arg8[%c0_18, %c0_19] : memref<1x32xf32, #tpu.memory_space<vmem>>, vector<1x32xf32>
    %35 = vector.broadcast %34 : vector<1x32xf32> to vector<8x32xf32>
    %36 = arith.addf %33, %35 : vector<8x32xf32>
    %c0_20 = arith.constant 0 : index
    %c0_21 = arith.constant 0 : index
    %37 = vector.load %arg9[%c0_20, %c0_21] : memref<32x32xbf16, #tpu.memory_space<vmem>>, vector<32x32xbf16>
    %cst_22 = arith.constant dense<0.000000e+00> : vector<8x32xf32>
    %38 = tpu.matmul %26, %37, %cst_22 {dimension_numbers = #tpu.dot_dimension_numbers<[1], [0], [0], [1], [0, 0, 1, 1], [], []>} : vector<8x32xbf16>, vector<32x32xbf16>, vector<8x32xf32> -> vector<8x32xf32>
    %c0_23 = arith.constant 0 : index
    %c0_24 = arith.constant 0 : index
    %39 = vector.load %arg10[%c0_23, %c0_24] : memref<1x32xf32, #tpu.memory_space<vmem>>, vector<1x32xf32>
    %40 = vector.broadcast %39 : vector<1x32xf32> to vector<8x32xf32>
    %41 = arith.addf %38, %40 : vector<8x32xf32>
    %42 = arith.truncf %31 : vector<8x32xf32> to vector<8x32xbf16>
    %c0_25 = arith.constant 0 : index
    %c0_26 = arith.constant 0 : index
    %c0_27 = arith.constant 0 : index
    %43 = vector.load %arg11[%c0_25, %c0_26, %c0_27] : memref<1x8x32xbf16, #tpu.memory_space<vmem>>, vector<1x8x32xbf16>
    %44 = vector.shape_cast %43 : vector<1x8x32xbf16> to vector<8x32xbf16>
    %45 = vector.shape_cast %42 : vector<8x32xbf16> to vector<1x8x32xbf16>
    tpu.vector_store %arg11[%c0_25, %c0_26, %c0_27], %45 {strides = array<i32>} : memref<1x8x32xbf16, #tpu.memory_space<vmem>>, vector<1x8x32xbf16>,
    %46 = arith.truncf %36 : vector<8x32xf32> to vector<8x32xbf16>
    %c0_28 = arith.constant 0 : index
    %c0_29 = arith.constant 0 : index
    %c0_30 = arith.constant 0 : index
    %47 = vector.load %arg12[%c0_28, %c0_29, %c0_30] : memref<1x8x32xbf16, #tpu.memory_space<vmem>>, vector<1x8x32xbf16>
    %48 = vector.shape_cast %47 : vector<1x8x32xbf16> to vector<8x32xbf16>
    %49 = vector.shape_cast %46 : vector<8x32xbf16> to vector<1x8x32xbf16>
    tpu.vector_store %arg12[%c0_28, %c0_29, %c0_30], %49 {strides = array<i32>} : memref<1x8x32xbf16, #tpu.memory_space<vmem>>, vector<1x8x32xbf16>,
    %50 = arith.truncf %41 : vector<8x32xf32> to vector<8x32xbf16>
    %c0_31 = arith.constant 0 : index
    %c0_32 = arith.constant 0 : index
    %c0_33 = arith.constant 0 : index
    %51 = vector.load %arg13[%c0_31, %c0_32, %c0_33] : memref<1x8x32xbf16, #tpu.memory_space<vmem>>, vector<1x8x32xbf16>
    %52 = vector.shape_cast %51 : vector<1x8x32xbf16> to vector<8x32xbf16>
    %53 = vector.shape_cast %50 : vector<8x32xbf16> to vector<1x8x32xbf16>
    tpu.vector_store %arg13[%c0_31, %c0_32, %c0_33], %53 {strides = array<i32>} : memref<1x8x32xbf16, #tpu.memory_space<vmem>>, vector<1x8x32xbf16>,
    return
  }
  func.func @transform_0(%arg0: i32, %arg1: i32) -> (i32, i32, i32) {
    %c0_i32 = arith.constant 0 : i32
    %c0_i32_0 = arith.constant 0 : i32
    return %arg0, %arg1, %c0_i32 : i32, i32, i32
  }
  func.func @transform_1(%arg0: i32, %arg1: i32) -> (i32, i32) {
    %c0_i32 = arith.constant 0 : i32
    %c0_i32_0 = arith.constant 0 : i32
    %c0_i32_1 = arith.constant 0 : i32
    return %c0_i32, %c0_i32_0 : i32, i32
  }
  func.func @transform_2(%arg0: i32, %arg1: i32) -> (i32, i32) {
    %c0_i32 = arith.constant 0 : i32
    %c0_i32_0 = arith.constant 0 : i32
    %c0_i32_1 = arith.constant 0 : i32
    return %c0_i32, %c0_i32_0 : i32, i32
  }
  func.func @transform_3(%arg0: i32, %arg1: i32) -> (i32, i32) {
    %c0_i32 = arith.constant 0 : i32
    %c0_i32_0 = arith.constant 0 : i32
    %c0_i32_1 = arith.constant 0 : i32
    return %c0_i32, %c0_i32_0 : i32, i32
  }
  func.func @transform_4(%arg0: i32, %arg1: i32) -> (i32, i32) {
    %c0_i32 = arith.constant 0 : i32
    %c0_i32_0 = arith.constant 0 : i32
    %c0_i32_1 = arith.constant 0 : i32
    return %c0_i32, %c0_i32_0 : i32, i32
  }
  func.func @transform_5(%arg0: i32, %arg1: i32) -> (i32, i32) {
    %c0_i32 = arith.constant 0 : i32
    %c0_i32_0 = arith.constant 0 : i32
    %c0_i32_1 = arith.constant 0 : i32
    return %c0_i32, %c0_i32_0 : i32, i32
  }
  func.func @transform_6(%arg0: i32, %arg1: i32) -> (i32, i32) {
    %c0_i32 = arith.constant 0 : i32
    %c0_i32_0 = arith.constant 0 : i32
    %c0_i32_1 = arith.constant 0 : i32
    return %c0_i32, %c0_i32_0 : i32, i32
  }
  func.func @transform_7(%arg0: i32, %arg1: i32) -> (i32, i32) {
    %c0_i32 = arith.constant 0 : i32
    %c0_i32_0 = arith.constant 0 : i32
    %c0_i32_1 = arith.constant 0 : i32
    return %c0_i32, %c0_i32_0 : i32, i32
  }
  func.func @transform_8(%arg0: i32, %arg1: i32) -> (i32, i32) {
    %c0_i32 = arith.constant 0 : i32
    %c0_i32_0 = arith.constant 0 : i32
    %c0_i32_1 = arith.constant 0 : i32
    return %c0_i32, %c0_i32_0 : i32, i32
  }
  func.func @transform_9(%arg0: i32, %arg1: i32) -> (i32, i32, i32) {
    %c0_i32 = arith.constant 0 : i32
    %c0_i32_0 = arith.constant 0 : i32
    return %arg0, %arg1, %c0_i32 : i32, i32, i32
  }
  func.func @transform_10(%arg0: i32, %arg1: i32) -> (i32, i32, i32) {
    %c0_i32 = arith.constant 0 : i32
    %c0_i32_0 = arith.constant 0 : i32
    return %arg0, %arg1, %c0_i32 : i32, i32, i32
  }
  func.func @transform_11(%arg0: i32, %arg1: i32) -> (i32, i32, i32) {
    %c0_i32 = arith.constant 0 : i32
    %c0_i32_0 = arith.constant 0 : i32
    return %arg0, %arg1, %c0_i32 : i32, i32, i32
  }
}

</mosaic_0001>

<bundles_post_ra>
// kernel: tpu_custom_call.1
= control target key start
LH: loop header
LB: loop body
LE: loop exit
PB: predicated region body
PF: predicated region fallthrough
CT: control target
= control target key end

     0   :  { %s1842_s0 = inlined_call_operand.hbm [shape: f32[2,8,32], index: 0, kind: input, shape index: {}]   ;;  %s1843_s1 = inlined_call_operand.vmem [shape: f32[1,32], index: 1, kind: input, shape index: {}]   ;;  %s1844_s2 = inlined_call_operand.vmem [shape: f32[1,32], index: 2, kind: input, shape index: {}]   ;;  %s1845_s3 = inlined_call_operand.hbm [shape: bf16[32,32], index: 3, kind: input, shape index: {}]   ;;  %s1846_s4 = inlined_call_operand.hbm [shape: f32[1,32], index: 4, kind: input, shape index: {}]   ;;  %s1847_s5 = inlined_call_operand.vmem [shape: bf16[32,32], index: 5, kind: input, shape index: {}]   ;;  %s1848_s6 = inlined_call_operand.vmem [shape: f32[1,32], index: 6, kind: input, shape index: {}]   ;;  %s1849_s7 = inlined_call_operand.hbm [shape: bf16[32,32], index: 7, kind: input, shape index: {}]   ;;  %s1850_s8 = inlined_call_operand.vmem [shape: f32[1,32], index: 8, kind: input, shape index: {}]   ;;  %s1851_s9 = inlined_call_operand.hbm [shape: bf16[2,8,32], index: 9, kind: output, shape index: {0}]   ;;  %s1852_s10 = inlined_call_operand.hbm [shape: bf16[2,8,32], index: 10, kind: output, shape index: {1}]   ;;  %s1853_s11 = inlined_call_operand.hbm [shape: bf16[2,8,32], index: 11, kind: output, shape index: {2}]  }
   0x1   :  { %1863 = sst [smem:[#allocation21_spill]] %s1842_s0 }
   0x2   :  { %1864 = sst [smem:[#allocation22_spill]] %s1843_s1 }
   0x3   :  { %1865 = sst [smem:[#allocation23_spill]] %s1844_s2 }
   0x4   :  { %1866 = sst [smem:[#allocation24_spill]] %s1848_s6 }
   0x5   :  { %1867 = sst [smem:[#allocation25_spill]] %s1850_s8 }
   0x6   :  { %1868 = sst [smem:[#allocation26_spill]] %s1851_s9 }
   0x7   :  { %1869 = sst [smem:[#allocation27_spill]] %s1852_s10 }
   0x8   :  { %1870 = sst [smem:[#allocation28_spill]] %s1853_s11 }
   0x9   :  { %17 = vsyncpa [#allocation3], 0 }
   0xa   :  { %19 = vsyncpa [#allocation3 + $0x1], 0 }
   0xb   :  { %20 = vsyncpa [#allocation6], 0 }
   0xc   :  { %21 = vsyncpa [#allocation9], 0 }
   0xd   :  { %22 = vsyncpa [#allocation4], 0 }
   0xe   :  { %24 = vsyncpa [#allocation4 + $0x1], 0 }
   0xf   :  { %25 = vsyncpa [#allocation12], 0 }
  0x10   :  { %27 = vsyncpa [#allocation12 + $0x1], 0  ;;  %s1465_s17 = smov 0   ;;  %s1467_s18 = smov 0  }
  0x11   :  { %s1469_s19 = smov 0   ;;  %s1471_s20 = smov 0  }
  0x12   :  { %s1473_s21 = smov 0   ;;  %s1475_s22 = smov 0  }
  0x13 LB: > { %1871 = sst [smem:[#allocation19_spill]] %s1372_s17  ;;  %s1496_s23 = sadd.s32 4294967295, %s1392_s22   ;;  %s1392_s22 = sphi %s1475_s22, %s33_s22   ;;  %s1388_s21 = sphi %s1473_s21, %s1906_s21   ;;  %s1384_s20 = sphi %s1471_s20, %s1905_s20   ;;  %s1380_s19 = sphi %s1469_s19, %s1904_s19   ;;  %s1376_s18 = sphi %s1467_s18, %s1903_s18   ;;  %s1372_s17 = sphi %s1465_s17, %s1902_s17  }
  0x14   : > { %s1854_s24 = sadd.s32 4294967294, %s1392_s22   ;;  %p67_p0 = scmp.ne.s32.totalorder %s1376_s18, %s1372_s17 }
  0x15   : > { %p1858_p1 = scmp.eq.s32.totalorder %s1496_s23, 0  ;;  %p267_p3 = scmp.eq.s32.totalorder %s1854_s24, 1 }
  0x16   : > { %p943_p5 = scmp.ge.s32.totalorder %s1392_s22, 1  ;;  %p330_p7 = scmp.lt.s32.totalorder %s1392_s22, 3 }
  0x17   : > { %p1507_p4 = por %p1858_p1, %p67_p0  ;;  %p1512_p6 = por %p267_p3, %p67_p0 }
  0x18   : > { %p1517_p8 = pnand %p943_p5, %p330_p7  ;;  %s1394_s28 = smov [#allocation5]  }
  0x19   : > { %s1872_s25 = scalar_select %p1507_p4, 1, 0 }
  0x1a   : > { %s1873_s26 = scalar_select %p1512_p6, 1, 0 }
  0x1b   : > { %s1875_s27 = scalar_select %p1517_p8, 1, 0 }
  0x1c   : > { %1874 = sst [smem:[#allocation20_spill]] %s1873_s26  ;;  %s348_s29 = sshll.u32 %s1394_s28, 4  ;;  %s1521_s29 = int_to_ptr.vmem [resolvable:$true] %s348_s29 }
  0x1d   : > { %p1033_p9 = pneg %p1517_p8  ;;  %s1395_s12 = smov [#allocation7]  }
  0x1e   : > { %s362_s13 = sshll.u32 %s1395_s12, 4  ;;  %s1396_s14 = smov [#allocation8]   ;;  %s1532_s13 = int_to_ptr.vmem [resolvable:$true] %s362_s13 }
  0x1f   : > { %p1528_p11 = pnand %p1033_p9, %p1858_p1  ;;  %s1534_s15 = sshll.u32 %s1396_s14, 4  ;;  %s379_s15 = int_to_ptr.vmem [resolvable:$true] %s1534_s15 }
  0x20   : > { %s1128_s24 = scalar_lea.hbm %s1845_s3, 256 }
  0x21   : > { %p1129_p12 = scmp.ne.s32.totalorder %s1845_s3, %s1128_s24  ;;  %p1544_p13 = pneg %p1528_p11 }
  0x22   : > { %p1135_p5 = scmp.lt.u32.totalorder %s1128_s24, %s1845_s3 }
  0x23   : > { %p1131_p0 = pnand %p1544_p13, %p1129_p12 }
  0x25   : > { %p1132_p3 = pneg %p1131_p0 }
  0x27   : > { %p1137_p7 = pnand %p1135_p5, %p1132_p3 }
  0x29   : > { %1140 = shalt.err (!%p1137_p7)
}
  0x2a   : > { %s1141_s17 = scalar_lea.vmem %s1521_s29, 256  ;;  %p1149_p2 = scmp.lt.s32.totalorder %s1521_s29, %s1521_s29 }
  0x2b   : > { %p1142_p9 = scmp.ne.s32.totalorder %s1521_s29, %s1141_s17  ;;  %p1150_p6 = scmp.lt.s32.totalorder %s1141_s17, %s1141_s17 }
  0x2d   : > { %p1144_p10 = pnand %p1142_p9, %p1544_p13  ;;  %p1151_p12 = por %p1150_p6, %p1149_p2 }
  0x2f   : > { %p1145_p1 = pneg %p1144_p10 }
  0x31   : > { %p1152_p0 = pnand %p1151_p12, %p1145_p1 }
  0x33   : > { %1155 = shalt.err (!%p1152_p0)
}
  0x34   : > { %s1397_s26 = smov 64   ;;  %s1398_s24 = smov 4  }
  0x35   : > { %1036 = dma.hbm_to_vmem [thread:$0]  (!%p1528_p11), %s1845_s3, 256, %s1521_s29, [#allocation6], %s1397_s26, %s1397_s26, %s1398_s24  }
  0x36   : > { %s1156_s17 = scalar_lea.hbm %s1846_s4, 16 }
  0x37   : > { %p1157_p1 = scmp.ne.s32.totalorder %s1846_s4, %s1156_s17  ;;  %p1163_p10 = scmp.lt.u32.totalorder %s1156_s17, %s1846_s4 }
  0x39   : > { %p1159_p2 = pnand %p1157_p1, %p1544_p13 }
  0x3b   : > { %p1160_p6 = pneg %p1159_p2 }
  0x3d   : > { %p1165_p3 = pnand %p1163_p10, %p1160_p6 }
  0x3f   : > { %1168 = shalt.err (!%p1165_p3)
}
  0x40   : > { %s1169_s29 = scalar_lea.vmem %s1532_s13, 16  ;;  %s1176_s8 = scalar_lea.vmem %s1532_s13, 32 }
  0x41   : > { %p1170_p5 = scmp.ne.s32.totalorder %s1532_s13, %s1169_s29  ;;  %p1177_p12 = scmp.lt.s32.totalorder %s1532_s13, %s1532_s13 }
  0x42   : > { %p1178_p0 = scmp.lt.s32.totalorder %s1176_s8, %s1169_s29 }
  0x43   : > { %p1172_p7 = pnand %p1170_p5, %p1544_p13 }
  0x44   : > { %p1179_p1 = por %p1178_p0, %p1177_p12 }
  0x45   : > { %p1173_p9 = pneg %p1172_p7 }
  0x47   : > { %p1180_p2 = pnand %p1179_p1, %p1173_p9 }
  0x49   : > { %1183 = shalt.err (!%p1180_p2)
}
  0x4a   : > { %1039 = dma.hbm_to_vmem [thread:$0]  (!%p1528_p11), %s1846_s4, 16, %s1532_s13, [#allocation6]  }
  0x4b   : > { %s1184_s28 = scalar_lea.hbm %s1849_s7, 256 }
  0x4c   : > { %p1185_p6 = scmp.ne.s32.totalorder %s1849_s7, %s1184_s28  ;;  %p1191_p5 = scmp.lt.u32.totalorder %s1184_s28, %s1849_s7 }
  0x4e   : > { %p1187_p10 = pnand %p1185_p6, %p1544_p13 }
  0x50   : > { %p1188_p3 = pneg %p1187_p10 }
  0x52   : > { %p1193_p7 = pnand %p1191_p5, %p1188_p3 }
  0x54   : > { %1196 = shalt.err (!%p1193_p7)
}
  0x55   : > { %s1197_s8 = scalar_lea.vmem %s379_s15, 256  ;;  %p1205_p1 = scmp.lt.s32.totalorder %s379_s15, %s379_s15 }
  0x56   : > { %p1198_p9 = scmp.ne.s32.totalorder %s379_s15, %s1197_s8  ;;  %p1206_p2 = scmp.lt.s32.totalorder %s1197_s8, %s1197_s8 }
  0x58   : > { %p1200_p12 = pnand %p1198_p9, %p1544_p13  ;;  %p1207_p4 = por %p1206_p2, %p1205_p1 }
  0x5a   : > { %p1201_p0 = pneg %p1200_p12 }
  0x5c   : > { %p1208_p8 = pnand %p1207_p4, %p1201_p0 }
  0x5e   : > { %1211 = shalt.err (!%p1208_p8)
}
  0x5f   : > { %1042 = dma.hbm_to_vmem [thread:$0]  (!%p1528_p11), %s1849_s7, 256, %s379_s15, [#allocation9], %s1397_s26, %s1397_s26, %s1398_s24  }
  0x60   : > { %s54_s11 = sadd.s32 1, %s1380_s19  ;;  %s45_s30 = sadd.s32 1, %s1388_s21 }
  0x61   : > { %p61_p4 = scmp.ne.s32.totalorder %s1380_s19, %s1376_s18  ;;  %p47_p8 = scmp.ge.s32.totalorder %s45_s30, 2 }
  0x62   : > { %p62_p13 = scmp.eq.s32.totalorder %s1392_s22, 0  ;;  %p1878_p6 = scmp.eq.s32.totalorder %s1496_s23, 1 }
  0x63   : > { %p1060_p3 = scmp.lt.s32.totalorder %s1392_s22, 2  ;;  %s1908_s30 = smov (%p47_p8, %s45_s30), 0 }
  0x64   : > { %p1621_p10 = por %p1878_p6, %p61_p4  ;;  %p63_p5 = por %p62_p13, %p61_p4 }
  0x65   : > { %s395_s10 = sand.u32 1, %s1380_s19   ;;  %s49_s16 = ssub.s32 %s1388_s21, %s1908_s30 }
  0x66   : > { %p52_p7 = scmp.eq.s32.totalorder %s49_s16, 0  ;;  %s948_s15 = sshll.u32 %s395_s10, 3 }
  0x67   : > { %s949_s26 = sshll.u32 %s1388_s21, 7  ;;  %s1880_s0 = sld [smem:[#allocation21_spill]] }
  0x68   : > { %s1633_s24 = scalar_select %p52_p7, %s1380_s19, %s54_s11  }
  0x69   : > { %s399_s17 = scalar_lea.vmem [#allocation2], %s948_s15  ;;  %p1644_p11 = pnand %p1060_p3, %p63_p5 }
  0x6a   : > { %s407_s29 = sshll.u32 %s399_s17, 4  ;;  %s396_s13 = scalar_lea.sflag [#allocation3], %s395_s10  ;;  %s1640_s29 = int_to_ptr.vmem [resolvable:$true] %s407_s29 }
  0x6b   : > { %p1214_p12 = pneg %p1644_p11 }
  0x6d   : > { %s1638_s14 = scalar_lea.hbm %s1880_s0, %s949_s26  ;;  %s1217_s15 = scalar_lea.hbm %s1880_s0, 256 }
  0x6e   : > { %s1212_s6 = scalar_lea.hbm %s1638_s14, 128  ;;  %p1218_p2 = scmp.lt.u32.totalorder %s1638_s14, %s1880_s0 }
  0x6f   : > { %p1213_p9 = scmp.ne.s32.totalorder %s1638_s14, %s1212_s6  ;;  %p1219_p4 = scmp.lt.u32.totalorder %s1217_s15, %s1212_s6 }
  0x70   : > { %p1221_p13 = scmp.lt.u32.totalorder %s1212_s6, %s1638_s14 }
  0x71   : > { %p1215_p0 = pnand %p1214_p12, %p1213_p9  ;;  %p1220_p8 = por %p1219_p4, %p1218_p2 }
  0x73   : > { %p1216_p1 = pneg %p1215_p0  ;;  %p1222_p6 = por %p1221_p13, %p1220_p8 }
  0x75   : > { %p1223_p3 = pnand %p1222_p6, %p1216_p1 }
  0x77   : > { %1226 = shalt.err (!%p1223_p3)
}
  0x78   : > { %s1227_s10 = scalar_lea.vmem %s1640_s29, 128  ;;  %s1399_s12 = smov [#allocation2]  }
  0x79   : > { %p1228_p5 = scmp.ne.s32.totalorder %s1640_s29, %s1227_s10  ;;  %s1232_s17 = sshll.u32 %s1399_s12, 4  ;;  %s1233_s17 = int_to_ptr.vmem [resolvable:$false] %s1232_s17 }
  0x7a   : > { %s1234_s11 = scalar_lea.vmem %s1233_s17, 256  ;;  %p1235_p0 = scmp.lt.s32.totalorder %s1640_s29, %s1233_s17 }
  0x7b   : > { %p1230_p7 = pnand %p1228_p5, %p1214_p12  ;;  %p1236_p2 = scmp.lt.s32.totalorder %s1234_s11, %s1227_s10 }
  0x7d   : > { %p1231_p9 = pneg %p1230_p7  ;;  %p1237_p4 = por %p1236_p2, %p1235_p0 }
  0x7f   : > { %p1238_p8 = pnand %p1237_p4, %p1231_p9 }
  0x81   : > { %1241 = shalt.err (!%p1238_p8)
}
  0x82   : > { %1046 = dma.hbm_to_vmem [thread:$0]  (!%p1644_p11), %s1638_s14, 128, %s1640_s29, %s396_s13  }
  0x83   : > { %p1882_p1 = scmp.ne.s32.totalorder %s1875_s27, 0 }
  0x84   : > { %s1676_s6 = sand.u32 (!%p1882_p1), 1, %s1376_s18   ;;  %p1883_p12 = scmp.ne.s32.totalorder (!%p1882_p1), %s1872_s25, 0 }
  0x85   : > { %416 = sbr.rel (%p1882_p1) target bundleno = 741 (0x2e5), region = 56  ;;  %s951_s16 = sshll.u32 (!%p1882_p1), %s1676_s6, 3 }
  0x86   : > { %s419_s15 = scalar_lea.sflag (!%p1882_p1), [#allocation3], %s1676_s6  ;;  %s422_s26 = scalar_lea.vmem (!%p1882_p1), [#allocation2], %s951_s16 }
  0x8c   : > { %1351 = dma.done.wait (%p1883_p12), %s419_s15, 128  }
  0x8d   : > { %1353 = vsyncadd (%p1883_p12), %s419_s15, 4294967168  ;;  %p1884_p13 = scmp.eq.s32.totalorder %s1496_s23, 0 }
  0x8f   : > { %1355 = dma.done.wait (%p1884_p13), [#allocation6], 272   ;;  %p1885_p11 = pmov %p1884_p13 }
  0x91   : > { %1357 = vsyncadd (%p1885_p11), [#allocation6], 4294967024  ;;  %p1886_p6 = pmov %p1885_p11 }
  0x93   : > { %1359 = dma.done.wait (%p1886_p6), [#allocation9], 256   ;;  %p1887_p3 = pmov %p1886_p6 }
  0x94   : > { %vm487_vm0 = vcmask 261120   ;;  %v484_v0 = vld [vmem:[%s422_s26] sm:$0xff]  ;;  %v1120_v7 = vld [vmem:[#allocation5] sm:$0xff]   ;;  %v1400_v9 = vmov 0.0   ;;  %v1122_v10 = vld [vmem:[#allocation5 + $0x8] sm:$0xff]   ;;  %vm1401_vm1 = vmmov 0  }
  0x95   : > { %1361 = vsyncadd (%p1887_p3), [#allocation9], 4294967040  ;;  %v488_v1 = vsel %vm487_vm0, %v484_v0, 0.0  ;;  %v1121_v8 = vld [vmem:[%s1847_s5] sm:$0xff]   ;;  %989 = vmatprep.subr.bf16.mxu0 %v1400_v9  ;;  %997 = vmatprep.subr.bf16.mxu1 %v1400_v9  ;;  %v1123_v11 = vld [vmem:[%s1847_s5 + $0x8] sm:$0xff]   ;;  %s1888_s1 = sld [smem:[#allocation22_spill]] }
  0x96   : > { %489 = vadd.xlane.f32.xlu0 %v488_v1  ;;  %990 = vmatpush3.bf16.msra.mxu0 %v1120_v7  ;;  %s1889_s2 = sld [smem:[#allocation23_spill]]  ;;  %v1124_v21 = vld [vmem:[#allocation8] sm:$0xff]   ;;  %v1125_v23 = vld [vmem:[#allocation8 + $0x8] sm:$0xff]   ;;  %s1713_s12 = sshll.u32 %s1676_s6, 2  ;;  %v960_v24 = vld [vmem:[#allocation7] ss:$0 sm:$0xff] }
  0x97   : > { %998 = vmatpush3.bf16.msra.mxu1 %v1121_v8  ;;  %991 = vmatprep.subr.bf16.mxu0 %v1400_v9  ;;  %s1890_s16 = sld [smem:[#allocation24_spill]]  ;;  %s721_s15 = sand.u32 1, %s1496_s23   ;;  %vm710_vm2 = vcmask 257024  }
  0x98   : > { %999 = vmatprep.subr.bf16.mxu1 %v1400_v9  ;;  %993 = vmatprep.mubr.msk.bf16.mxu0 %vm1401_vm1, %v1400_v9  ;;  %s1720_s26 = sshll.u32 %s1384_s20, 6  ;;  %s475_s25 = scalar_lea.vmem [#allocation11], %s1713_s12 }
  0x99   : > { %1001 = vmatprep.mubr.msk.bf16.mxu1 %vm1401_vm1, %v1400_v9  ;;  %s755_s27 = sshll.u32 %s475_s25, 4  ;;  %s468_s14 = scalar_lea.vmem [#allocation10], %s1713_s12  ;;  %s1730_s27 = int_to_ptr.vmem [resolvable:$true] %s755_s27 }
  0x9a   : > { %992 = vmatpush3.bf16.msra.mxu0 %v1122_v10  ;;  %s741_s29 = sshll.u32 %s468_s14, 4  ;;  %s1891_s20 = sld [smem:[#allocation27_spill]]  ;;  %s1738_s29 = int_to_ptr.vmem [resolvable:$true] %s741_s29 }
  0x9b   : > { %1000 = vmatpush3.bf16.msra.mxu1 %v1123_v11  ;;  %1005 = vmatprep.subr.bf16.mxu0 %v1400_v9  ;;  %v958_v16 = vld [vmem:[%s1888_s1] ss:$0 sm:$0xff]  ;;  %s1893_s11 = sld [smem:[#allocation26_spill]]  ;;  %s1745_s0 = scalar_lea.sflag [#allocation12], %s721_s15 }
  0x9c   : > { %v959_v18 = vld [vmem:[%s1889_s2] ss:$0 sm:$0xff]  ;;  %s1242_s1 = scalar_lea.vmem %s1730_s27, 64  ;;  %s1402_s10 = smov [#allocation11]  }
  0x9d   : > { %v964_v25 = vld [vmem:[%s1890_s16] ss:$0 sm:$0xff]  ;;  %p1243_p5 = scmp.ne.s32.totalorder %s1730_s27, %s1242_s1  ;;  %s1246_s17 = sshll.u32 %s1402_s10, 4  ;;  %s1247_s17 = int_to_ptr.vmem [resolvable:$false] %s1246_s17 }
  0x9e   : > { %s1248_s2 = scalar_lea.vmem %s1247_s17, 128  ;;  %p1249_p0 = scmp.lt.s32.totalorder %s1730_s27, %s1247_s17 }
  0x9f   : > { %p1244_p7 = pnand %p1243_p5, %p1621_p10  ;;  %p1250_p2 = scmp.lt.s32.totalorder %s1248_s2, %s1242_s1 }
  0xa0   : > { %s1892_s13 = smov %s1891_s20  ;;  %s1728_s28 = scalar_lea.hbm %s1891_s20, %s1720_s26 }
  0xa1   : > { %s1736_s16 = scalar_lea.hbm %s1893_s11, %s1720_s26  ;;  %s1894_s20 = sld [smem:[#allocation25_spill]] }
  0xa2   : > { %p1245_p9 = pneg %p1244_p7  ;;  %p1251_p4 = por %p1250_p2, %p1249_p0 }
  0xa4   : > { %p1252_p8 = pnand %p1251_p4, %p1245_p9 }
  0xa7   : > { %v968_v38 = vld [vmem:[%s1894_s20] ss:$0 sm:$0xff] }
 0x123   : > { %v490_v2 = vpop.xlane.xlu0 %489 }
 0x124   : > { %v492_v3 = vmul.f32 0.03125, %v490_v2 }
 0x126   : > { %v493_v4 = vsub.f32 %v484_v0, %v492_v3 }
 0x128   : > { %v494_v5 = vmul.f32 %v493_v4, %v493_v4 }
 0x12a   : > { %v495_v6 = vsel %vm487_vm0, %v494_v5, 0.0 }
 0x12b   : > { %496 = vadd.xlane.f32.xlu0 %v495_v6 }
 0x1b8   : > { %v497_v12 = vpop.xlane.xlu0 %496 }
 0x1b9   : > { %v498_v13 = vmul.f32 0.03125, %v497_v12 }
 0x1bb   : > { %v499_v14 = vadd.f32 1e-05, %v498_v13 }
 0x1bd   : > { %1126 = vrsqrt.f32 %v499_v14 }
 0x1c7   : > { %v1127_v15 = vpop.eup %1126 }
 0x1c8   : > { %v501_v17 = vmul.f32 %v1127_v15, %v493_v4 }
 0x1ca   : > { %v508_v19 = vmul.f32 %v958_v16, %v501_v17 }
 0x1cc   : > { %v515_v20 = vadd.f32 %v959_v18, %v508_v19 }
 0x1ce   : > { %v516_v22 = vpack.c.bf16 %v515_v20, %v515_v20 }
 0x1d0   : > { %994 = vmatmul.mubr.msk.bf16.vlgmr.msra.gmra.mrb[0].mxu0 %vm487_vm0, %v516_v22  ;;  %1002 = vmatmul.mubr.msk.bf16.vlgmr.msra.gmra.mrb[0].mxu1 %vm487_vm0, %v516_v22 }
 0x1d1   : > { %1006 = vmatpush3.bf16.msra.mxu0 %v1124_v21  ;;  %1009 = vmatprep.mubr.msk.bf16.mxu0 %vm1401_vm1, %v1400_v9 }
 0x1d2   : > { %1007 = vmatprep.subr.bf16.mxu0 %v1400_v9 }
 0x1d5   : > { %1008 = vmatpush3.bf16.msra.mxu0 %v1125_v23 }
 0x1d8   : > { %1010 = vmatmul.mubr.msk.bf16.vlgmr.msra.gmra.mrb[4].mxu0 %vm487_vm0, %v516_v22 }
 0x2a3   : > { %v577_v26 = vpop.f32.mrb[0].mxu0  ;;  %v640_v27 = vpop.f32.mrb[0].mxu1 }
 0x2a4   : > { %v578_v28 = vadd.f32 %v960_v24, %v577_v26  ;;  %v641_v29 = vadd.f32 %v964_v25, %v640_v27  ;;  %v995_v30 = vpop.f32.mrb[1].mxu0  ;;  %v1003_v31 = vpop.f32.mrb[1].mxu1 }
 0x2a5   : > { %v580_v32 = vpop.f32.mrb[2].mxu0  ;;  %v643_v33 = vpop.f32.mrb[2].mxu1 }
 0x2a6   : > { %v709_v34 = vpack.c.bf16 %v578_v28, %v578_v28  ;;  %v712_v35 = vpack.c.bf16 %v641_v29, %v641_v29  ;;  %v996_v36 = vpop.f32.mrb[3].mxu0  ;;  %v1004_v37 = vpop.f32.mrb[3].mxu1 }
 0x2a8   : > { %713 = vst.msk [vmem:[%s475_s25] sm:$0xf] %vm710_vm2, %v712_v35  ;;  %711 = vst.msk [vmem:[%s468_s14] sm:$0xf] %vm710_vm2, %v709_v34 }
 0x2a9   : > { %1255 = shalt.err (!%p1252_p8)
}
 0x2aa   : > { %s1256_s15 = scalar_lea.hbm %s1728_s28, 64  ;;  %s1260_s8 = scalar_lea.hbm %s1892_s13, 128 }
 0x2ab   : > { %p1257_p1 = scmp.ne.s32.totalorder %s1728_s28, %s1256_s15  ;;  %p1261_p11 = scmp.lt.u32.totalorder %s1728_s28, %s1892_s13 }
 0x2ac   : > { %p1262_p6 = scmp.lt.u32.totalorder %s1260_s8, %s1256_s15  ;;  %p1264_p5 = scmp.lt.u32.totalorder %s1256_s15, %s1728_s28 }
 0x2ad   : > { %p1258_p12 = pnand %p1257_p1, %p1621_p10 }
 0x2ae   : > { %p1263_p3 = por %p1262_p6, %p1261_p11 }
 0x2af   : > { %p1259_p13 = pneg %p1258_p12 }
 0x2b0   : > { %p1265_p7 = por %p1264_p5, %p1263_p3 }
 0x2b2   : > { %p1266_p9 = pnand %p1265_p7, %p1259_p13 }
 0x2b4   : > { %1269 = shalt.err (!%p1266_p9)
}
 0x2b5   : > { %1028 = dma.vmem_to_hbm [thread:$0]  (%p1621_p10), %s1730_s27, 64, %s1728_s28, %s1745_s0  }
 0x2b6   : > { %s717_s1 = scalar_lea.sflag [#allocation4], %s1676_s6  ;;  %s1270_s2 = scalar_lea.vmem %s1738_s29, 64 }
 0x2b7   : > { %p1271_p0 = scmp.ne.s32.totalorder %s1738_s29, %s1270_s2  ;;  %s1403_s10 = smov [#allocation10]  }
 0x2b8   : > { %s1274_s17 = sshll.u32 %s1403_s10, 4  ;;  %s1275_s17 = int_to_ptr.vmem [resolvable:$false] %s1274_s17 }
 0x2b9   : > { %p1272_p2 = pnand %p1271_p0, %p1621_p10  ;;  %s1276_s15 = scalar_lea.vmem %s1275_s17, 128 }
 0x2ba   : > { %p1277_p8 = scmp.lt.s32.totalorder %s1738_s29, %s1275_s17  ;;  %p1278_p1 = scmp.lt.s32.totalorder %s1276_s15, %s1270_s2 }
 0x2bb   : > { %p1273_p4 = pneg %p1272_p2 }
 0x2bc   : > { %p1279_p12 = por %p1278_p1, %p1277_p8 }
 0x2be   : > { %p1280_p13 = pnand %p1279_p12, %p1273_p4 }
 0x2c0   : > { %1283 = shalt.err (!%p1280_p13)
}
 0x2c1   : > { %s1284_s6 = scalar_lea.hbm %s1736_s16, 64  ;;  %s1288_s25 = scalar_lea.hbm %s1893_s11, 128 }
 0x2c2   : > { %p1285_p11 = scmp.ne.s32.totalorder %s1736_s16, %s1284_s6  ;;  %p1289_p5 = scmp.lt.u32.totalorder %s1736_s16, %s1893_s11 }
 0x2c3   : > { %p1290_p7 = scmp.lt.u32.totalorder %s1288_s25, %s1284_s6  ;;  %p1292_p0 = scmp.lt.u32.totalorder %s1284_s6, %s1736_s16 }
 0x2c4   : > { %p1286_p6 = pnand %p1285_p11, %p1621_p10 }
 0x2c5   : > { %p1291_p9 = por %p1290_p7, %p1289_p5 }
 0x2c6   : > { %p1287_p3 = pneg %p1286_p6 }
 0x2c7   : > { %p1293_p2 = por %p1292_p0, %p1291_p9 }
 0x2c9   : > { %p1294_p4 = pnand %p1293_p2, %p1287_p3 }
 0x2cb   : > { %1297 = shalt.err (!%p1294_p4)
}
 0x2cc   : > { %1027 = dma.vmem_to_hbm [thread:$0]  (%p1621_p10), %s1738_s29, 64, %s1736_s16, %s717_s1   ;;  %v703_v39 = vpop.f32.mrb[4].mxu0 }
 0x2cd   : > { %s482_s23 = scalar_lea.vmem [#allocation13], %s1713_s12  ;;  %v704_v40 = vadd.f32 %v968_v38, %v703_v39  ;;  %v1011_v41 = vpop.f32.mrb[5].mxu0  ;;  %s1895_s17 = sld [smem:[#allocation28_spill]] }
 0x2ce   : > { %s769_s20 = sshll.u32 %s482_s23, 4  ;;  %v706_v42 = vpop.f32.mrb[6].mxu0  ;;  %s1404_s12 = smov [#allocation13]   ;;  %s770_s20 = int_to_ptr.vmem [resolvable:$true] %s769_s20 }
 0x2cf   : > { %v714_v43 = vpack.c.bf16 %v704_v40, %v704_v40  ;;  %v1012_v44 = vpop.f32.mrb[7].mxu0  ;;  %s1298_s27 = scalar_lea.vmem %s770_s20, 64  ;;  %s1302_s29 = sshll.u32 %s1404_s12, 4  ;;  %s1303_s29 = int_to_ptr.vmem [resolvable:$false] %s1302_s29 }
 0x2d0   : > { %p1299_p8 = scmp.ne.s32.totalorder %s770_s20, %s1298_s27  ;;  %s1304_s16 = scalar_lea.vmem %s1303_s29, 128 }
 0x2d1   : > { %715 = vst.msk [vmem:[%s482_s23] sm:$0xf] %vm710_vm2, %v714_v43  ;;  %p1305_p13 = scmp.lt.s32.totalorder %s770_s20, %s1303_s29  ;;  %p1306_p11 = scmp.lt.s32.totalorder %s1304_s16, %s1298_s27 }
 0x2d2   : > { %p1300_p1 = pnand %p1299_p8, %p1621_p10 }
 0x2d3   : > { %s1896_s15 = smov %s1895_s17  ;;  %s1796_s6 = scalar_lea.hbm %s1895_s17, %s1720_s26 }
 0x2d4   : > { %p1301_p12 = pneg %p1300_p1  ;;  %p1307_p6 = por %p1306_p11, %p1305_p13 }
 0x2d6   : > { %p1308_p3 = pnand %p1307_p6, %p1301_p12 }
 0x2d8   : > { %1311 = shalt.err (!%p1308_p3)
}
 0x2d9   : > { %s1312_s26 = scalar_lea.hbm %s1796_s6, 64  ;;  %s1316_s25 = scalar_lea.hbm %s1896_s15, 128 }
 0x2da   : > { %p1313_p5 = scmp.ne.s32.totalorder %s1796_s6, %s1312_s26  ;;  %p1317_p0 = scmp.lt.u32.totalorder %s1796_s6, %s1896_s15 }
 0x2db   : > { %p1318_p2 = scmp.lt.u32.totalorder %s1316_s25, %s1312_s26  ;;  %p1320_p8 = scmp.lt.u32.totalorder %s1312_s26, %s1796_s6 }
 0x2dc   : > { %p1314_p7 = pnand %p1313_p5, %p1621_p10 }
 0x2dd   : > { %p1319_p4 = por %p1318_p2, %p1317_p0 }
 0x2de   : > { %p1315_p9 = pneg %p1314_p7 }
 0x2df   : > { %p1321_p1 = por %p1320_p8, %p1319_p4 }
 0x2e1   : > { %p1322_p12 = pnand %p1321_p1, %p1315_p9 }
 0x2e3   : > { %1325 = shalt.err (!%p1322_p12)
}
 0x2e4   : > { %1029 = dma.vmem_to_hbm [thread:$0]  (%p1621_p10), %s770_s20, 64, %s1796_s6, %s1745_s0  }
 0x2e5 PF: > { %s1897_s23 = sld [smem:[#allocation19_spill]]  ;;  %s1898_s2 = sld [smem:[#allocation20_spill]] }
 0x2e6   : > { %p1900_p11 = scmp.ge.s32.totalorder %s1392_s22, 2 }
 0x2eb   : > { %s781_s10 = sand.u32 1, %s1897_s23   ;;  %p1899_p13 = scmp.ne.s32.totalorder %s1898_s2, 0 }
 0x2ec   : > { %s782_s17 = scalar_lea.sflag [#allocation4], %s781_s10 }
 0x2ed   : > { %p1048_p6 = pnand %p1900_p11, %p1899_p13 }
 0x2ef   : > { %1363 = dma.done.wait (!%p1048_p6), %s782_s17, 64  }
 0x2f0   : > { %1365 = vsyncadd (!%p1048_p6), %s782_s17, 4294967232  ;;  %s1901_s27 = sadd.s32 4294967294, %s1392_s22  }
 0x2f1   : > { %s790_s12 = sand.u32 1, %s1901_s27  }
 0x2f2   : > { %s791_s29 = scalar_lea.sflag [#allocation12], %s790_s12 }
 0x2f3   : > { %1367 = dma.done.wait (!%p1048_p6), %s791_s29, 128  }
 0x2f4   : > { %1369 = vsyncadd (!%p1048_p6), %s791_s29, 4294967168  ;;  %s33_s22 = sadd.s32 1, %s1392_s22   ;;  %s1902_s17 = smov %s1376_s18 }
 0x2f5   : > { %p30_p10 = scmp.ge.s32.totalorder %s33_s22, 4   ;;  %s1903_s18 = smov %s1380_s19 }
 0x2f6   : > { %s1904_s19 = smov %s1633_s24  ;;  %s1905_s20 = smov %s1388_s21 }
 0x2f7   : > { %s1906_s21 = smov %s1908_s30  ;;  %32 = sbr.rel (!%p30_p10) target bundleno = 19 (0x13), region = 145 }
 0x2fe   :  { %805 = vsyncpa [#allocation3], 1 }
 0x2ff   :  { %807 = vsyncpa [#allocation3 + $0x1], 1 }
 0x300   :  { %808 = vsyncpa [#allocation6], 1 }
 0x301   :  { %809 = vsyncpa [#allocation9], 1 }
 0x302   :  { %810 = vsyncpa [#allocation4], 1 }
 0x303   :  { %812 = vsyncpa [#allocation4 + $0x1], 1 }
 0x304   :  { %813 = vsyncpa [#allocation12], 1 }
 0x305   :  { %815 = vsyncpa [#allocation12 + $0x1], 1 }

</bundles_post_ra>
